<compile_context>
chip_gen: v5e
topology: v5e:2x2
jax: 0.10.0
libtpu: 0.0.40
codegen_flags: <defaults>
</compile_context>

<pallas_src>
from functools import partial

import jax
import jax.numpy as jnp
from jax.experimental import pallas as pl
from jax.experimental.pallas import tpu as pltpu

# ---- small, forward-consistent shapes -------------------------------------
EMB = 32          # emb_size   (768 in the original)
SEQ = 8           # seq_len    (128 in the original)
NCLASSES = 6      # nclasses
BATCH = 2
VOCAB = 50
DROPOUT_P = 0.5

FEAT = EMB * SEQ  # contraction dim F (98304 in the original)

# ---- kernel tiling constants ----------------------------------------------
C_PAD = 128       # lane-dense padded class dim (true classes live in [:NCLASSES])
MB = 128          # batch block used only when B > MB (toy B=2 uses one full block)


# ---------------------------------------------------------------------------
# Pallas kernels: dense head  out = x @ W + b, optionally with fused dropout.
# Single K step (grid has no reduction axis at these shapes).
# ---------------------------------------------------------------------------
def _head_kernel(x_ref, w_ref, b_ref, o_ref):
    acc = jnp.dot(x_ref[...], w_ref[...], preferred_element_type=jnp.float32)
    o_ref[...] = (acc + b_ref[...]).astype(o_ref.dtype)


def _head_kernel_dropout(x_ref, m_ref, w_ref, b_ref, o_ref, *, inv_keep):
    # Zero dropped elements in bf16 via the precomputed {0,1} mask; apply the
    # 1/(1-p) scale once to the f32 accumulator instead of per input element.
    x = x_ref[...] * m_ref[...]
    acc = jnp.dot(x, w_ref[...], preferred_element_type=jnp.float32)
    o_ref[...] = (acc * jnp.float32(inv_keep) + b_ref[...]).astype(o_ref.dtype)


def classifier_head(flat, w_p, b_p, *, dropout_mask=None):
    """flat: (B, F) float, w_p: (F, C_PAD) bf16, b_p: (1, C_PAD) f32 -> (B, NCLASSES) f32."""
    B, F = flat.shape
    assert w_p.shape == (F, C_PAD) and b_p.shape == (1, C_PAD)

    x = flat.astype(jnp.bfloat16)
    m = None if dropout_mask is None else dropout_mask.astype(jnp.bfloat16)

    # Batch blocking: a single full-extent block when B <= MB (no pad, no copy);
    # otherwise pad B up to a multiple of MB (zero rows are harmless).
    if B <= MB:
        mb, B_pad = B, B
    else:
        mb = MB
        B_pad = pl.cdiv(B, MB) * MB
        if B_pad != B:
            x = jnp.zeros((B_pad, F), x.dtype).at[:B].set(x)
            if m is not None:
                m = jnp.zeros((B_pad, F), m.dtype).at[:B].set(m)
    nb = B_pad // mb

    in_specs = [pl.BlockSpec((mb, F), lambda i: (i, 0))]
    args = [x]
    if m is not None:
        in_specs.append(pl.BlockSpec((mb, F), lambda i: (i, 0)))
        args.append(m)
    in_specs += [
        # Constant block index across the batch grid -> weight/bias stay
        # resident in VMEM (no re-fetch per batch block).
        pl.BlockSpec((F, C_PAD), lambda i: (0, 0)),
        pl.BlockSpec((1, C_PAD), lambda i: (0, 0)),
    ]
    args += [w_p, b_p]

    kernel = (_head_kernel if m is None
              else partial(_head_kernel_dropout, inv_keep=1.0 / (1.0 - DROPOUT_P)))

    bytes_accessed = (x.size * 2
                      + (m.size * 2 if m is not None else 0)
                      + nb * w_p.size * 2          # weight read once per batch block
                      + b_p.size * 4
                      + B_pad * C_PAD * 4)

    out = pl.pallas_call(
        kernel,
        out_shape=jax.ShapeDtypeStruct((B_pad, C_PAD), jnp.float32),
        grid=(nb,),
        in_specs=in_specs,
        out_specs=pl.BlockSpec((mb, C_PAD), lambda i: (i, 0)),
        compiler_params=pltpu.CompilerParams(
            dimension_semantics=("parallel",),       # batch blocks -> v7x megacore
            vmem_limit_bytes=32 * 1024 * 1024),      # safe on v7x's 64 MiB VMEM
        cost_estimate=pl.CostEstimate(
            flops=2 * B_pad * F * C_PAD,
            transcendentals=0,
            bytes_accessed=bytes_accessed),
    )(*args)
    return out[:B, :NCLASSES]


# ---------------------------------------------------------------------------
# Deterministic stand-in for the GPT2 backbone (plain JAX glue).
# ---------------------------------------------------------------------------
def gpt_backbone_stub(input_ids, mask, params):
    """Token + position embedding + final LayerNorm -> (B, S, E).

    `mask` mirrors the PyTorch signature; the stand-in backbone does not use it
    (a real GPT2 uses it inside attention).
    """
    del mask
    wte, wpe, gamma, beta = params["wte"], params["wpe"], params["gamma"], params["beta"]
    h = wte[input_ids] + wpe[jnp.arange(SEQ)][None, :, :]        # (B, S, E)
    mu = jnp.mean(h, axis=-1, keepdims=True)
    var = jnp.var(h, axis=-1, keepdims=True)
    return gamma * (h - mu) * jax.lax.rsqrt(var + 1e-5) + beta   # (B, S, E)


def gpt_classifier_forward(input_ids, mask, params, *, training=False, dropout_key=None):
    gpt_out = gpt_backbone_stub(input_ids, mask, params)         # (B, S, E)
    B = gpt_out.shape[0]
    flat = gpt_out.reshape(B, -1)                                # (B, S*E), like .view(B, -1)
    dmask = None
    if training:
        dmask = jax.random.bernoulli(dropout_key, 1.0 - DROPOUT_P, flat.shape)
    return classifier_head(flat, params["w_p"], params["b_p"], dropout_mask=dmask)


# ---------------------------------------------------------------------------
def init_params(key):
    k_wte, k_wpe, k_w, k_b = jax.random.split(key, 4)
    F = FEAT
    # nn.Linear(F, C): weight (C, F), bias (C,).  Stored transposed (F, C).
    w = (jax.random.uniform(k_w, (F, NCLASSES), jnp.float32, minval=-1.0, maxval=1.0)
         / jnp.sqrt(F))
    b = (jax.random.uniform(k_b, (1, NCLASSES), jnp.float32, minval=-1.0, maxval=1.0)
         / jnp.sqrt(F))
    # Padded, bf16-cast weight / f32 bias built ONCE here (hoisted out of the
    # per-call path): lane-dense (F, 128) bf16 weight, (1, 128) f32 bias.
    w_p = jnp.zeros((F, C_PAD), jnp.bfloat16).at[:, :NCLASSES].set(w.astype(jnp.bfloat16))
    b_p = jnp.zeros((1, C_PAD), jnp.float32).at[:, :NCLASSES].set(b)
    return {
        "wte": 0.02 * jax.random.normal(k_wte, (VOCAB, EMB), jnp.float32),
        "wpe": 0.02 * jax.random.normal(k_wpe, (SEQ, EMB), jnp.float32),
        "gamma": jnp.ones((EMB,), jnp.float32),
        "beta": jnp.zeros((EMB,), jnp.float32),
        "w_p": w_p,
        "b_p": b_p,
    }


if __name__ == "__main__":
    key = jax.random.PRNGKey(0)
    k_ids, k_params, k_drop = jax.random.split(key, 3)

    params = init_params(k_params)
    input_ids = jax.random.randint(k_ids, (BATCH, SEQ), 0, VOCAB, dtype=jnp.int32)
    attn_mask = jnp.ones((BATCH, SEQ), jnp.int32)

    # Eval-mode forward (nn.Dropout is identity at eval time).
    logits = gpt_classifier_forward(input_ids, attn_mask, params, training=False)
    logits = jax.block_until_ready(logits)
    assert logits.shape == (BATCH, NCLASSES), logits.shape

    # Correctness check of the Pallas head against a pure-JAX reference using
    # the same bf16 input rounding that feeds the MXU.
    gpt_out = gpt_backbone_stub(input_ids, attn_mask, params)
    flat = gpt_out.reshape(BATCH, -1)
    x_bf = flat.astype(jnp.bfloat16).astype(jnp.float32)
    w_f = params["w_p"][:, :NCLASSES].astype(jnp.float32)
    b_f = params["b_p"][:, :NCLASSES]
    ref = x_bf @ w_f + b_f
    assert jnp.allclose(logits, ref, atol=2e-3, rtol=2e-3), "eval mismatch vs reference"

    # Training path: dropout fused into the kernel via a precomputed mask.
    logits_tr = gpt_classifier_forward(input_ids, attn_mask, params,
                                       training=True, dropout_key=k_drop)
    logits_tr = jax.block_until_ready(logits_tr)
    assert logits_tr.shape == (BATCH, NCLASSES)
    keep = jax.random.bernoulli(k_drop, 1.0 - DROPOUT_P, flat.shape).astype(jnp.float32)
    ref_tr = ((x_bf * keep) @ w_f) * (1.0 / (1.0 - DROPOUT_P)) + b_f
    assert jnp.allclose(logits_tr, ref_tr, atol=2e-3, rtol=2e-3), "train mismatch vs reference"
    assert bool(jnp.all(jnp.isfinite(logits_tr)))

    print("KERNEL_OK")
</pallas_src>

<mosaic_0001>
module attributes {stable_mosaic.version = 11 : i64} {
  func.func @_head_kernel(%arg0: i32, %arg1: memref<2x256xbf16, #tpu.memory_space<vmem>>, %arg2: memref<256x128xbf16, #tpu.memory_space<vmem>>, %arg3: memref<1x128xf32, #tpu.memory_space<vmem>>, %arg4: memref<2x128xf32, #tpu.memory_space<vmem>>) attributes {dimension_semantics = [#tpu.dimension_semantics<parallel>], iteration_bounds = array<i64: 1>, scalar_prefetch = 0 : i64, scratch_operands = 0 : i64, tpu.core_type = #tpu.core_type<tc>, window_params = [{transform_indices = @transform_0, window_bounds = array<i64: 2, 256>}, {pipeline_mode = #tpu.pipeline_mode<synchronous>, transform_indices = @transform_1, window_bounds = array<i64: 256, 128>}, {pipeline_mode = #tpu.pipeline_mode<synchronous>, transform_indices = @transform_2, window_bounds = array<i64: 1, 128>}, {transform_indices = @transform_3, window_bounds = array<i64: 2, 128>}]} {
    %c0 = arith.constant 0 : index
    %c0_0 = arith.constant 0 : index
    %0 = vector.load %arg1[%c0, %c0_0] : memref<2x256xbf16, #tpu.memory_space<vmem>>, vector<2x256xbf16>
    %c0_1 = arith.constant 0 : index
    %c0_2 = arith.constant 0 : index
    %1 = vector.load %arg2[%c0_1, %c0_2] : memref<256x128xbf16, #tpu.memory_space<vmem>>, vector<256x128xbf16>
    %cst = arith.constant dense<0.000000e+00> : vector<2x128xf32>
    %2 = tpu.matmul %0, %1, %cst {dimension_numbers = #tpu.dot_dimension_numbers<[1], [0], [0], [1], [0, 0, 1, 1], [], []>} : vector<2x256xbf16>, vector<256x128xbf16>, vector<2x128xf32> -> vector<2x128xf32>
    %c0_3 = arith.constant 0 : index
    %c0_4 = arith.constant 0 : index
    %3 = vector.load %arg3[%c0_3, %c0_4] : memref<1x128xf32, #tpu.memory_space<vmem>>, vector<1x128xf32>
    %4 = vector.broadcast %3 : vector<1x128xf32> to vector<2x128xf32>
    %5 = arith.addf %2, %4 : vector<2x128xf32>
    %c0_5 = arith.constant 0 : index
    %c0_6 = arith.constant 0 : index
    %6 = vector.load %arg4[%c0_5, %c0_6] : memref<2x128xf32, #tpu.memory_space<vmem>>, vector<2x128xf32>
    tpu.vector_store %arg4[%c0_5, %c0_6], %5 {strides = array<i32>} : memref<2x128xf32, #tpu.memory_space<vmem>>, vector<2x128xf32>,
    return
  }
  func.func @transform_0(%arg0: i32) -> (i32, i32) {
    %c0_i32 = arith.constant 0 : i32
    %c0_i32_0 = arith.constant 0 : i32
    return %arg0, %c0_i32 : i32, i32
  }
  func.func @transform_1(%arg0: i32) -> (i32, i32) {
    %c0_i32 = arith.constant 0 : i32
    %c0_i32_0 = arith.constant 0 : i32
    %c0_i32_1 = arith.constant 0 : i32
    return %c0_i32, %c0_i32_0 : i32, i32
  }
  func.func @transform_2(%arg0: i32) -> (i32, i32) {
    %c0_i32 = arith.constant 0 : i32
    %c0_i32_0 = arith.constant 0 : i32
    %c0_i32_1 = arith.constant 0 : i32
    return %c0_i32, %c0_i32_0 : i32, i32
  }
  func.func @transform_3(%arg0: i32) -> (i32, i32) {
    %c0_i32 = arith.constant 0 : i32
    %c0_i32_0 = arith.constant 0 : i32
    return %arg0, %c0_i32 : i32, i32
  }
}

</mosaic_0001>

<bundles_post_ra>
// kernel: tpu_custom_call.1
= control target key start
LH: loop header
LB: loop body
LE: loop exit
PB: predicated region body
PF: predicated region fallthrough
CT: control target
= control target key end

     0   :  { %8 = vsyncpa [#allocation3], 0  ;;  %s430_s0 = inlined_call_operand.hbm [shape: bf16[2,256], index: 0, kind: input, shape index: {}]   ;;  %s431_s1 = inlined_call_operand.hbm [shape: bf16[256,128], index: 1, kind: input, shape index: {}]   ;;  %s432_s2 = inlined_call_operand.vmem [shape: f32[1,128], index: 2, kind: input, shape index: {}]   ;;  %s433_s3 = inlined_call_operand.hbm [shape: f32[2,128], index: 3, kind: output, shape index: {}]  }
   0x1   :  { %9 = vsyncpa [#allocation6], 0 }
   0x2   :  { %10 = vsyncpa [#allocation4], 0  ;;  %s16_s14 = sshll.u32 %s430_s0, 4  ;;  %s393_s15 = smov [#allocation2]   ;;  %s17_s14 = int_to_ptr.hbm [resolvable:$true] %s16_s14 }
   0x3   :  { %s18_s16 = sshll.u32 %s393_s15, 4  ;;  %s26_s19 = sshll.u32 %s431_s1, 4  ;;  %s19_s16 = int_to_ptr.vmem [resolvable:$true] %s18_s16  ;;  %s27_s19 = int_to_ptr.hbm [resolvable:$true] %s26_s19 }
   0x4   :  { %21 = dma.hbm_to_vmem [thread:$0]  %s17_s14, 32, %s19_s16, [#allocation3]  }
   0x5   :  { %s394_s20 = smov [#allocation5]   ;;  %s395_s22 = smov 64  }
   0x6   :  { %s28_s21 = sshll.u32 %s394_s20, 4  ;;  %s396_s23 = smov 4   ;;  %s29_s21 = int_to_ptr.vmem [resolvable:$true] %s28_s21 }
   0x7   :  { %34 = dma.hbm_to_vmem [thread:$0]  %s27_s19, 2048, %s29_s21, [#allocation6], %s395_s22, %s395_s22, %s396_s23  }
   0x8   :  { %387 = dma.done.wait [#allocation3], 32  }
   0x9   :  { %388 = vsyncadd [#allocation3], 4294967264 }
   0xa   :  { %389 = dma.done.wait [#allocation6], 2048  }
   0xb   :  { %390 = vsyncadd [#allocation6], 4294965248  ;;  %v300_v0 = vld [vmem:[#allocation5 + $0x38] sm:$0xff]  ;;  %v299_v2 = vld [vmem:[#allocation5 + $0x30] sm:$0xff]  ;;  %s397_s24 = smov [#allocation7]   ;;  %s218_s28 = sshll.u32 %s433_s3, 4  ;;  %s219_s28 = int_to_ptr.hbm [resolvable:$true] %s218_s28 }
   0xc   :  { %v308_v1 = vld [vmem:[#allocation5 + $0x78] sm:$0xff]  ;;  %184 = vmatpush.bf16.msra.mxu0 %v300_v0  ;;  %v307_v3 = vld [vmem:[#allocation5 + $0x70] sm:$0xff]  ;;  %v298_v5 = vld [vmem:[#allocation5 + $0x28] sm:$0xff]  ;;  %s216_s25 = sshll.u32 %s397_s24, 4  ;;  %s217_s25 = int_to_ptr.vmem [resolvable:$true] %s216_s25 }
   0xd   :  { %197 = vmatpush.bf16.msra.mxu1 %v308_v1  ;;  %v45_v4 = vld [vmem:[#allocation2] sm:$0x3]  ;;  %v306_v6 = vld [vmem:[#allocation5 + $0x68] sm:$0xff]  ;;  %v297_v7 = vld [vmem:[#allocation5 + $0x20] sm:$0xff] }
   0xe   :  { %83 = vst [vmem:[#allocation1] ss:$9 sm:$0xff] %v45_v4  ;;  %v305_v8 = vld [vmem:[#allocation5 + $0x60] sm:$0xff]  ;;  %v296_v9 = vld [vmem:[#allocation5 + $0x18] sm:$0xff]  ;;  %v295_v11 = vld [vmem:[#allocation5 + $0x10] sm:$0xff] }
   0xf   :  { %v304_v10 = vld [vmem:[#allocation5 + $0x58] sm:$0xff]  ;;  %v303_v12 = vld [vmem:[#allocation5 + $0x50] sm:$0xff]  ;;  %v294_v13 = vld [vmem:[#allocation5 + $0x8] sm:$0xff] }
  0x10   :  { %185 = vmatpush.bf16.msra.mxu0 %v299_v2  ;;  %v302_v14 = vld [vmem:[#allocation5 + $0x48] sm:$0xff]  ;;  %v293_v15 = vld [vmem:[#allocation5] sm:$0xff]  ;;  %v314_v19 = vld [vmem:[%s432_s2] ss:$0 sm:$0xff] }
  0x11   :  { %198 = vmatpush.bf16.msra.mxu1 %v307_v3  ;;  %v301_v16 = vld [vmem:[#allocation5 + $0x40] sm:$0xff] }
  0x14   :  { %186 = vmatpush.bf16.msra.mxu0 %v298_v5 }
  0x15   :  { %199 = vmatpush.bf16.msra.mxu1 %v306_v6  ;;  %v84_v17 = vld [vmem:[#allocation1] sm:$0xff]  ;;  %v85_v18 = vld [vmem:[#allocation1 + $0x9] sm:$0xff] }
  0x18   :  { %187 = vmatpush.bf16.msra.mxu0 %v297_v7 }
  0x19   :  { %200 = vmatpush.bf16.msra.mxu1 %v305_v8 }
  0x1c   :  { %188 = vmatpush.bf16.msra.mxu0 %v296_v9 }
  0x1d   :  { %201 = vmatpush.bf16.msra.mxu1 %v304_v10 }
  0x20   :  { %189 = vmatpush.bf16.msra.mxu0 %v295_v11 }
  0x21   :  { %202 = vmatpush.bf16.msra.mxu1 %v303_v12 }
  0x24   :  { %190 = vmatpush.bf16.msra.mxu0 %v294_v13 }
  0x25   :  { %203 = vmatpush.bf16.msra.mxu1 %v302_v14 }
  0x28   :  { %191 = vmatpush.bf16.msra.mxu0 %v293_v15 }
  0x29   :  { %204 = vmatpush.bf16.msra.mxu1 %v301_v16 }
  0x2b   :  { %192 = vmatmul.bf16.vlgmr.msra.gmra.mxu0 %v84_v17 }
  0x2c   :  { %205 = vmatmul.bf16.vlgmr.msra.gmra.mxu1 %v85_v18 }
  0xa8   :  { %v193_v20 = vpop.f32.mrf.mxu0 }
  0xa9   :  { %v206_v21 = vpop.f32.mrf.mxu1  ;;  %v194_v22 = vadd.f32 %v314_v19, %v193_v20 }
  0xab   :  { %v207_v23 = vadd.f32 %v206_v21, %v194_v22 }
  0xad   :  { %210 = vst [vmem:[#allocation7] sm:$0x3] %v207_v23 }
  0xae   :  { %221 = dma.vmem_to_hbm [thread:$0]  %s217_s25, 32, %s219_s28, [#allocation4]  }
  0xb0   :  { %v195_v24 = vpop.f32.mrf.mxu0 }
  0xb1   :  { %v208_v25 = vpop.f32.mrf.mxu1 }
  0xb2   :  { %391 = dma.done.wait [#allocation4], 32  }
  0xb3   :  { %392 = vsyncadd [#allocation4], 4294967264 }
  0xb4   :  { %226 = vsyncpa [#allocation3], 1 }
  0xb5   :  { %227 = vsyncpa [#allocation6], 1 }
  0xb6   :  { %228 = vsyncpa [#allocation4], 1 }

</bundles_post_ra>
